<compile_context>
chip_gen: v7x
topology: tpu7x:2x2x1
jax: 0.10.0
libtpu: 0.0.40
codegen_flags: <defaults>
</compile_context>

<pallas_src>
import functools

import jax
import jax.numpy as jnp
from jax.experimental import pallas as pl
from jax.experimental.pallas import tpu as pltpu


def _round_up(n, m):
    return ((n + m - 1) // m) * m


def _target_block_bytes():
    """Generation-aware input block size (bytes)."""
    try:
        kind = getattr(jax.devices()[0], "device_kind", "").lower()
    except Exception:
        kind = ""
    if ("v6" in kind) or ("v7" in kind) or ("7x" in kind):
        return 4 << 20   # v6e/v7x: 32 MiB scoped VMEM default -> 4 MiB blocks
    return 2 << 20       # v5e / unknown: 16 MiB scoped VMEM default -> 2 MiB


def _jumprelu_kernel(jump_ref, x_ref, out_ref, part_ref, *, total, needs_mask):
    # jump_ref : (1, 1) f32 threshold in SMEM
    # x_ref    : (TM, 128) input tile in VMEM
    # out_ref  : (TM, 128) output tile (aliases the input buffer)
    # part_ref : (8, 128) f32 per-tile partial sparsity sums
    x = x_ref[...]
    r, c = x.shape
    jump = jump_ref[0, 0]  # float32 scalar

    # Compare in f32 so the threshold is not re-quantized for low-precision
    # activations.  In f32, x > jump  <=>  (x - jump) > 0 (IEEE, gradual
    # underflow), so the subtract is dropped (VALU trim).
    mask = x.astype(jnp.float32) > jump

    # out = x * h  ==  where(mask, x, 0)   (fused, no explicit cast + mul)
    out_ref[...] = jnp.where(mask, x, 0)

    # Sparsity contribution of this tile; mask out padded elements and the
    # OOB rows of a partial last block (their input contents are unspecified).
    hf = mask.astype(jnp.float32)
    if needs_mask:
        row0 = pl.program_id(0) * r
        row_idx = jax.lax.broadcasted_iota(jnp.int32, (r, c), 0) + row0
        full_rows, rem = divmod(total, c)
        if rem == 0:
            valid = row_idx < full_rows
        else:
            col_idx = jax.lax.broadcasted_iota(jnp.int32, (r, c), 1)
            valid = (row_idx < full_rows) | (
                (row_idx == full_rows) & (col_idx < rem))
        hf = jnp.where(valid, hf, 0.0)

    # Fold into an (8, 128) lane/sublane-dense partial-sum block (summed in
    # the wrapper).  Pure elementwise adds across vregs; no carried dependency
    # across grid steps.
    part_ref[...] = jnp.sum(hf.reshape(r // 8, 8, c), axis=0)


def jump_relu(inp, jump, *, lanes=128, block_bytes=None):
    """JumpReLU forward.

    inp  : arbitrary-shaped float array (e.g. NCHW [B, C, H, W])
    jump : scalar threshold parameter (shape (1,) like the torch Parameter)
    returns (out, sparcity): out.shape == inp.shape, sparcity is a f32 scalar.
    """
    orig_shape = inp.shape
    dtype = inp.dtype
    total = int(inp.size)
    if total == 0:
        return inp, jnp.float32(0.0)

    itemsize = jnp.dtype(dtype).itemsize
    sub_mult = {4: 8, 2: 16, 1: 32}.get(itemsize, 8)
    if block_bytes is None:
        block_bytes = _target_block_bytes()

    rows_valid = pl.cdiv(total, lanes)
    # Tiny inputs: pad rows up to one sublane group so tile rows stay a
    # multiple of the packing; cost is negligible at this size.
    rows = max(rows_valid, sub_mult)

    # Tile rows: as many as the VMEM budget allows, a multiple of the sublane
    # packing, never larger than the array extent (partial last block is fine).
    budget_rows = max(sub_mult,
                      (block_bytes // (lanes * itemsize)) // sub_mult * sub_mult)
    tm = max(sub_mult, min(budget_rows, (rows // sub_mult) * sub_mult))
    num_tiles = pl.cdiv(rows, tm)

    # Keep >= 2 grid steps when possible so the "parallel" axis can split
    # across v7x's two TensorCores.
    if num_tiles == 1 and rows >= 2 * sub_mult:
        tm = _round_up(pl.cdiv(rows, 2), sub_mult)
        num_tiles = pl.cdiv(rows, tm)

    # Only the element padding needed to form the (rows, lanes) view; padded
    # with zeros (no -inf hazard) and excluded from the sparsity count by the
    # in-kernel mask.  Lane-aligned inputs take a zero-copy path.
    pad = rows * lanes - total
    flat = inp.reshape(-1)
    if pad:
        flat = jnp.pad(flat, (0, pad))
    x2d = flat.reshape(rows, lanes)
    jump2d = jnp.asarray(jump, dtype=jnp.float32).reshape(1, 1)

    needs_mask = (pad != 0) or (rows % tm != 0)
    kernel = functools.partial(_jumprelu_kernel, total=total,
                               needs_mask=needs_mask)

    out2d, partials = pl.pallas_call(
        kernel,
        out_shape=(
            jax.ShapeDtypeStruct((rows, lanes), dtype),
            jax.ShapeDtypeStruct((8 * num_tiles, lanes), jnp.float32),
        ),
        grid_spec=pltpu.PrefetchScalarGridSpec(
            num_scalar_prefetch=0,
            grid=(num_tiles,),
            in_specs=[
                pl.BlockSpec(memory_space=pltpu.MemorySpace.SMEM),  # jump scalar
                pl.BlockSpec((tm, lanes), lambda i: (i, 0)),        # x tile
            ],
            out_specs=[
                pl.BlockSpec((tm, lanes), lambda i: (i, 0)),        # out tile
                pl.BlockSpec((8, lanes), lambda i: (i, 0)),         # partial sums
            ],
        ),
        compiler_params=pltpu.CompilerParams(
            dimension_semantics=("parallel",),  # no carried dep -> megacore OK
        ),
        input_output_aliases={1: 0},  # donate x2d -> out2d
    )(jump2d, x2d)

    out_flat = out2d.reshape(-1)
    if pad:
        out_flat = out_flat[:total]
    out = out_flat.reshape(orig_shape)
    sparcity = jnp.sum(partials)
    return out, sparcity


def _reference(x, jump_param):
    h = ((x - jump_param[0]) > 0).astype(x.dtype)
    return x * h, jnp.sum(h).astype(jnp.float32)


if __name__ == "__main__":
    # Small NCHW input consistent with a conv-style SAE activation map.
    x = jax.random.normal(jax.random.PRNGKey(0), (2, 4, 16, 16),
                          dtype=jnp.float32)
    # Deterministic parameter init, matching torch.nn.Parameter(torch.zeros(1)).
    jump_param = jnp.zeros((1,), dtype=jnp.float32)

    out, sparcity = jump_relu(x, jump_param)
    out = jax.block_until_ready(out)
    sparcity = jax.block_until_ready(sparcity)
    out_ref, sp_ref = _reference(x, jump_param)
    assert out.shape == x.shape and out.dtype == x.dtype
    assert jnp.allclose(out, out_ref), "output mismatch"
    assert jnp.allclose(sparcity, sp_ref), "sparsity mismatch"

    # Ragged-size path (exercises the tiny-row padding + in-kernel masking).
    x2 = jax.random.normal(jax.random.PRNGKey(1), (3, 5, 7), dtype=jnp.float32)
    jump2 = jnp.full((1,), 0.25, dtype=jnp.float32)
    out2, sp2 = jump_relu(x2, jump2)
    out2 = jax.block_until_ready(out2)
    out2_ref, sp2_ref = _reference(x2, jump2)
    assert jnp.allclose(out2, out2_ref), "ragged output mismatch"
    assert jnp.allclose(sp2, sp2_ref), "ragged sparsity mismatch"

    # Lane-aligned but non-tile-divisible rows (exercises the partial last
    # block + two-tile megacore split without any padding or post-slice).
    x3 = jax.random.normal(jax.random.PRNGKey(2), (2, 12, 128),
                           dtype=jnp.float32)
    jump3 = jnp.full((1,), -0.1, dtype=jnp.float32)
    out3, sp3 = jump_relu(x3, jump3)
    out3 = jax.block_until_ready(out3)
    out3_ref, sp3_ref = _reference(x3, jump3)
    assert jnp.allclose(out3, out3_ref), "partial-block output mismatch"
    assert jnp.allclose(sp3, sp3_ref), "partial-block sparsity mismatch"

    print("KERNEL_OK")
</pallas_src>

<mosaic_0001>
module attributes {stable_mosaic.version = 11 : i64} {
  func.func @_jumprelu_kernel(%arg0: i32, %arg1: memref<1x1xf32, #tpu.memory_space<smem>>, %arg2: memref<8x128xf32, #tpu.memory_space<vmem>>, %arg3: memref<8x128xf32, #tpu.memory_space<vmem>>, %arg4: memref<8x128xf32, #tpu.memory_space<vmem>>) attributes {dimension_semantics = [#tpu.dimension_semantics<parallel>], iteration_bounds = array<i64: 2>, scalar_prefetch = 0 : i64, scratch_operands = 0 : i64, tpu.core_type = #tpu.core_type<tc>, window_params = [{transform_indices = @transform_0, window_bounds = array<i64: 1, 1>}, {transform_indices = @transform_1, window_bounds = array<i64: 8, 128>}, {transform_indices = @transform_2, window_bounds = array<i64: 8, 128>}, {transform_indices = @transform_3, window_bounds = array<i64: 8, 128>}]} {
    %c0 = arith.constant 0 : index
    %c0_0 = arith.constant 0 : index
    %0 = vector.load %arg2[%c0, %c0_0] : memref<8x128xf32, #tpu.memory_space<vmem>>, vector<8x128xf32>
    %c0_1 = arith.constant 0 : index
    %c0_2 = arith.constant 0 : index
    %1 = memref.load %arg1[%c0_1, %c0_2] : memref<1x1xf32, #tpu.memory_space<smem>>
    %2 = vector.broadcast %1 : f32 to vector<8x128xf32>
    %3 = arith.cmpf ogt, %0, %2 : vector<8x128xf32>
    %c0_i32 = arith.constant 0 : i32
    %4 = arith.sitofp %c0_i32 : i32 to f32
    %5 = vector.broadcast %4 : f32 to vector<8x128xf32>
    %6 = arith.select %3, %0, %5 : vector<8x128xi1>, vector<8x128xf32>
    %c0_3 = arith.constant 0 : index
    %c0_4 = arith.constant 0 : index
    %7 = vector.load %arg3[%c0_3, %c0_4] : memref<8x128xf32, #tpu.memory_space<vmem>>, vector<8x128xf32>
    tpu.vector_store %arg3[%c0_3, %c0_4], %6 {strides = array<i32>} : memref<8x128xf32, #tpu.memory_space<vmem>>, vector<8x128xf32>,
    %8 = arith.extui %3 : vector<8x128xi1> to vector<8x128xi32>
    %9 = arith.sitofp %8 : vector<8x128xi32> to vector<8x128xf32>
    %10 = vector.shape_cast %9 : vector<8x128xf32> to vector<1x8x128xf32>
    %cst = arith.constant dense<0.000000e+00> : vector<8x128xf32>
    %11 = vector.multi_reduction <add>, %10, %cst [0] : vector<1x8x128xf32> to vector<8x128xf32>
    %c0_5 = arith.constant 0 : index
    %c0_6 = arith.constant 0 : index
    %12 = vector.load %arg4[%c0_5, %c0_6] : memref<8x128xf32, #tpu.memory_space<vmem>>, vector<8x128xf32>
    tpu.vector_store %arg4[%c0_5, %c0_6], %11 {strides = array<i32>} : memref<8x128xf32, #tpu.memory_space<vmem>>, vector<8x128xf32>,
    return
  }
  func.func @transform_0(%arg0: i32) -> (i32, i32) {
    %c0_i32 = arith.constant 0 : i32
    %c0_i32_0 = arith.constant 0 : i32
    %c0_i32_1 = arith.constant 0 : i32
    return %c0_i32, %c0_i32_0 : i32, i32
  }
  func.func @transform_1(%arg0: i32) -> (i32, i32) {
    %c0_i32 = arith.constant 0 : i32
    %c0_i32_0 = arith.constant 0 : i32
    return %arg0, %c0_i32 : i32, i32
  }
  func.func @transform_2(%arg0: i32) -> (i32, i32) {
    %c0_i32 = arith.constant 0 : i32
    %c0_i32_0 = arith.constant 0 : i32
    return %arg0, %c0_i32 : i32, i32
  }
  func.func @transform_3(%arg0: i32) -> (i32, i32) {
    %c0_i32 = arith.constant 0 : i32
    %c0_i32_0 = arith.constant 0 : i32
    return %arg0, %c0_i32 : i32, i32
  }
}

</mosaic_0001>

<bundles_post_ra>
// kernel: tpu_custom_call.1
= control target key start
LH: loop header
LB: loop body
LE: loop exit
PB: predicated region body
PF: predicated region fallthrough
CT: control target
= control target key end

     0   :  { %s757_s0 = inlined_call_operand.<no memory space> [shape: f32[1,1], index: 0, kind: input, shape index: {}]   ;;  %s758_s1 = inlined_call_operand.hbm [shape: f32[16,128], index: 1, kind: input, shape index: {}, may-alias: {1,2}]   ;;  %s759_s2 = inlined_call_operand.hbm [shape: f32[16,128], index: 2, kind: output, shape index: {0}, may-alias: {1,2}]   ;;  %s760_s3 = inlined_call_operand.hbm [shape: f32[16,128], index: 3, kind: output, shape index: {1}]  }
   0x1   :  { %9 = sst [smem:[#allocation2]] %s757_s0 }
   0x2   :  { %10 = vsyncpa [#allocation4], 0 }
   0x3   :  { %12 = vsyncpa [#allocation4 + $0x1], 0 }
   0x4   :  { %13 = vsyncpa [#allocation5], 0 }
   0x5   :  { %15 = vsyncpa [#allocation5 + $0x1], 0 }
   0x6   :  { %16 = vsyncpa [#allocation8], 0 }
   0x7   :  { %18 = vsyncpa [#allocation8 + $0x1], 0  ;;  %s567_s14 = smov 0   ;;  %s569_s15 = smov 0  }
   0x8   :  { %s571_s16 = smov 0   ;;  %s573_s17 = smov 0  }
   0x9 LB: > { %s588_s0 = sadd.s32 4294967295, %s538_s17   ;;  %s342_s18 = sadd.s32 4294967294, %s538_s17   ;;  %s538_s17 = sphi %s573_s17, %s775_s17   ;;  %s534_s16 = sphi %s571_s16, %s774_s16   ;;  %s530_s15 = sphi %s569_s15, %s773_s15   ;;  %s526_s14 = sphi %s567_s14, %s772_s14  }
   0xa   : > { %s592_s19 = sadd.s32 1, %s538_s17   ;;  %s52_s20 = sadd.s32 1, %s534_s16 }
   0xb   : > { %s49_s21 = ssub.s32 %s538_s17, %s592_s19  ;;  %p59_p0 = scmp.ne.s32.totalorder %s534_s16, %s530_s15 }
   0xc   : > { %p50_p1 = scmp.eq.s32.totalorder %s49_s21, 0  ;;  %p60_p2 = scmp.eq.s32.totalorder %s538_s17, 0 }
   0xd   : > { %p65_p3 = scmp.ne.s32.totalorder %s530_s15, %s526_s14  ;;  %p66_p4 = scmp.eq.s32.totalorder %s588_s0, 0 }
   0xe   : > { %s604_s22 = scalar_select %p50_p1, %s534_s16, %s52_s20  }
   0xf   : > { %p606_p5 = por %p60_p2, %p59_p0  ;;  %p610_p6 = por %p66_p4, %p65_p3 }
  0x10   : > { %p89_p7 = scmp.eq.s32.totalorder %s588_s0, 1  ;;  %p95_p8 = scmp.eq.s32.totalorder %s342_s18, 1 }
  0x11   : > { %p375_p10 = scmp.lt.s32.totalorder %s538_s17, 2  ;;  %s144_s27 = sand.u32 1, %s534_s16  }
  0x12   : > { %p617_p11 = por %p89_p7, %p59_p0  ;;  %p621_p12 = por %p95_p8, %p65_p3 }
  0x13   : > { %s346_s28 = sshll.u32 %s538_s17, 7  ;;  %s345_s29 = sshll.u32 %s144_s27, 3 }
  0x14   : > { %s764_s25 = scalar_select %p617_p11, 1, 0 }
  0x15   : > { %s765_s26 = scalar_select %p621_p12, 1, 0 }
  0x16   : > { %s630_s5 = scalar_lea.hbm %s758_s1, %s346_s28  ;;  %s148_s6 = scalar_lea.vmem [#allocation3], %s345_s29 }
  0x17   : > { %s155_s7 = sshll.u32 %s148_s6, 4  ;;  %p634_p13 = pnand %p375_p10, %p606_p5  ;;  %s638_s7 = int_to_ptr.vmem [resolvable:$true] %s155_s7 }
  0x18   : > { %s145_s9 = scalar_lea.sflag [#allocation4], %s144_s27  ;;  %s410_s10 = scalar_lea.hbm %s630_s5, 128 }
  0x19   : > { %p411_p2 = scmp.ne.s32.totalorder %s630_s5, %s410_s10  ;;  %p412_p3 = pneg %p634_p13 }
  0x1a   : > { %s415_s13 = scalar_lea.hbm %s758_s1, 256  ;;  %p416_p5 = scmp.lt.u32.totalorder %s630_s5, %s758_s1 }
  0x1b   : > { %p413_p4 = pnand %p412_p3, %p411_p2  ;;  %p417_p8 = scmp.lt.u32.totalorder %s415_s13, %s410_s10 }
  0x1c   : > { %p419_p9 = scmp.lt.u32.totalorder %s410_s10, %s630_s5 }
  0x1d   : > { %p414_p7 = pneg %p413_p4  ;;  %p418_p10 = por %p417_p8, %p416_p5 }
  0x1f   : > { %p420_p0 = por %p419_p9, %p418_p10 }
  0x21   : > { %p421_p1 = pnand %p420_p0, %p414_p7 }
  0x23   : > { %424 = shalt.err (!%p421_p1)
}
  0x24   : > { %s425_s21 = scalar_lea.vmem %s638_s7, 128  ;;  %s540_s23 = smov [#allocation3]  }
  0x25   : > { %p426_p2 = scmp.ne.s32.totalorder %s638_s7, %s425_s21  ;;  %s430_s27 = sshll.u32 %s540_s23, 4  ;;  %s431_s27 = int_to_ptr.vmem [resolvable:$false] %s430_s27 }
  0x26   : > { %s432_s28 = scalar_lea.vmem %s431_s27, 256  ;;  %p433_p11 = scmp.lt.s32.totalorder %s638_s7, %s431_s27 }
  0x27   : > { %p428_p4 = pnand %p426_p2, %p412_p3  ;;  %p434_p5 = scmp.lt.s32.totalorder %s432_s28, %s425_s21 }
  0x29   : > { %p429_p12 = pneg %p428_p4  ;;  %p435_p8 = por %p434_p5, %p433_p11 }
  0x2b   : > { %p436_p9 = pnand %p435_p8, %p429_p12 }
  0x2d   : > { %439 = shalt.err (!%p436_p9)
}
  0x2e   : > { %367 = dma.hbm_to_vmem [thread:$0]  (!%p634_p13), %s630_s5, 128, %s638_s7, %s145_s9  }
  0x2f   : > { %p767_p0 = scmp.lt.s32.totalorder %s538_s17, 3  ;;  %p768_p1 = scmp.ge.s32.totalorder %s538_s17, 1 }
  0x31   : > { %p161_p3 = pnand %p768_p1, %p767_p0 }
  0x32   : > { %s672_s29 = sand.u32 (!%p161_p3), 1, %s530_s15  }
  0x33   : > { %164 = sbr.rel (%p161_p3) target bundleno = 110 (0x6e), region = 28  ;;  %s348_s30 = sshll.u32 (!%p161_p3), %s672_s29, 3 }
  0x34   : > { %s167_s4 = scalar_lea.sflag (!%p161_p3), [#allocation4], %s672_s29  ;;  %s170_s6 = scalar_lea.vmem (!%p161_p3), [#allocation3], %s348_s30 }
  0x3a   : > { %513 = dma.done.wait (%p610_p6), %s167_s4, 128  }
  0x3b   : > { %515 = vsyncadd (%p610_p6), %s167_s4, 4294967168  ;;  %s199_s5 = sld [smem:[#allocation2]]  ;;  %s190_s7 = scalar_lea.vmem [#allocation6], %s348_s30  ;;  %v198_v0 = vld [vmem:[%s170_s6] sm:$0xff]  ;;  %v541_v3 = vmov 0.0  }
  0x3c   : > { %s227_s8 = sshll.u32 %s190_s7, 4  ;;  %s197_s9 = scalar_lea.vmem [#allocation7], %s348_s30  ;;  %s681_s8 = int_to_ptr.vmem [resolvable:$true] %s227_s8 }
  0x3d   : > { %s240_s10 = sshll.u32 %s197_s9, 4  ;;  %s354_s11 = sshll.u32 %s588_s0, 7  ;;  %s683_s10 = int_to_ptr.vmem [resolvable:$true] %s240_s10 }
  0x3e   : > { %s688_s13 = scalar_lea.hbm %s759_s2, %s354_s11  ;;  %s693_s20 = scalar_lea.hbm %s760_s3, %s354_s11 }
  0x3f   : > { %s209_s21 = scalar_lea.sflag [#allocation5], %s672_s29  ;;  %s440_s23 = scalar_lea.vmem %s681_s8, 128 }
  0x40   : > { %p441_p6 = scmp.ne.s32.totalorder %s681_s8, %s440_s23  ;;  %p769_p11 = scmp.ne.s32.totalorder %s764_s25, 0 }
  0x41   : > { %v200_v1 = vstv %s199_s5  ;;  %s542_s27 = smov [#allocation6]  }
  0x42   : > { %vm201_vm0 = vcmp.gt.f32.partialorder %v198_v0, %v200_v1  ;;  %p442_p12 = pnand %p441_p6, %p769_p11  ;;  %s444_s28 = sshll.u32 %s542_s27, 4  ;;  %s445_s28 = int_to_ptr.vmem [resolvable:$false] %s444_s28 }
  0x43   : > { %v202_v2 = vsel %vm201_vm0, %v198_v0, 0.0  ;;  %v351_v4 = vsel %vm201_vm0, 1.0, %v541_v3  ;;  %s446_s30 = scalar_lea.vmem %s445_s28, 256  ;;  %p447_p7 = scmp.lt.s32.totalorder %s681_s8, %s445_s28 }
  0x44   : > { %203 = vst [vmem:[%s190_s7] sm:$0xff] %v202_v2  ;;  %207 = vst [vmem:[%s197_s9] sm:$0xff] %v351_v4  ;;  %p443_p13 = pneg %p442_p12  ;;  %p448_p10 = scmp.lt.s32.totalorder %s446_s30, %s440_s23 }
  0x46   : > { %p449_p2 = por %p448_p10, %p447_p7 }
  0x48   : > { %p450_p4 = pnand %p449_p2, %p443_p13 }
  0x4a   : > { %453 = shalt.err (!%p450_p4)
}
  0x4b   : > { %s454_s4 = scalar_lea.hbm %s688_s13, 128  ;;  %s458_s7 = scalar_lea.hbm %s759_s2, 256 }
  0x4c   : > { %p455_p5 = scmp.ne.s32.totalorder %s688_s13, %s454_s4  ;;  %p459_p0 = scmp.lt.u32.totalorder %s688_s13, %s759_s2 }
  0x4d   : > { %p460_p1 = scmp.lt.u32.totalorder %s458_s7, %s454_s4  ;;  %p462_p6 = scmp.lt.u32.totalorder %s454_s4, %s688_s13 }
  0x4e   : > { %p456_p8 = pnand %p455_p5, %p769_p11 }
  0x4f   : > { %p461_p3 = por %p460_p1, %p459_p0 }
  0x50   : > { %p457_p9 = pneg %p456_p8 }
  0x51   : > { %p463_p12 = por %p462_p6, %p461_p3 }
  0x53   : > { %p464_p13 = pnand %p463_p12, %p457_p9 }
  0x55   : > { %467 = shalt.err (!%p464_p13)
}
  0x56   : > { %360 = dma.vmem_to_hbm [thread:$0]  (%p769_p11), %s681_s8, 128, %s688_s13, %s209_s21  }
  0x57   : > { %s214_s24 = scalar_lea.sflag [#allocation8], %s672_s29  ;;  %s468_s12 = scalar_lea.vmem %s683_s10, 128 }
  0x58   : > { %p469_p7 = scmp.ne.s32.totalorder %s683_s10, %s468_s12  ;;  %s543_s0 = smov [#allocation7]  }
  0x59   : > { %s472_s18 = sshll.u32 %s543_s0, 4  ;;  %s473_s18 = int_to_ptr.vmem [resolvable:$false] %s472_s18 }
  0x5a   : > { %p470_p10 = pnand %p469_p7, %p769_p11  ;;  %s474_s23 = scalar_lea.vmem %s473_s18, 256 }
  0x5b   : > { %p475_p4 = scmp.lt.s32.totalorder %s683_s10, %s473_s18  ;;  %p476_p5 = scmp.lt.s32.totalorder %s474_s23, %s468_s12 }
  0x5c   : > { %p471_p2 = pneg %p470_p10 }
  0x5d   : > { %p477_p8 = por %p476_p5, %p475_p4 }
  0x5f   : > { %p478_p9 = pnand %p477_p8, %p471_p2 }
  0x61   : > { %481 = shalt.err (!%p478_p9)
}
  0x62   : > { %s482_s29 = scalar_lea.hbm %s693_s20, 128  ;;  %s486_s21 = scalar_lea.hbm %s760_s3, 256 }
  0x63   : > { %p483_p0 = scmp.ne.s32.totalorder %s693_s20, %s482_s29  ;;  %p487_p6 = scmp.lt.u32.totalorder %s693_s20, %s760_s3 }
  0x64   : > { %p488_p12 = scmp.lt.u32.totalorder %s486_s21, %s482_s29  ;;  %p490_p7 = scmp.lt.u32.totalorder %s482_s29, %s693_s20 }
  0x65   : > { %p484_p1 = pnand %p483_p0, %p769_p11 }
  0x66   : > { %p489_p13 = por %p488_p12, %p487_p6 }
  0x67   : > { %p485_p3 = pneg %p484_p1 }
  0x68   : > { %p491_p10 = por %p490_p7, %p489_p13 }
  0x6a   : > { %p492_p2 = pnand %p491_p10, %p485_p3 }
  0x6c   : > { %495 = shalt.err (!%p492_p2)
}
  0x6d   : > { %361 = dma.vmem_to_hbm [thread:$0]  (%p769_p11), %s683_s10, 128, %s693_s20, %s214_s24  }
  0x6e PF: > { %s252_s30 = sand.u32 1, %s526_s14   ;;  %p770_p4 = scmp.ne.s32.totalorder %s765_s26, 0 }
  0x6f   : > { %p771_p5 = scmp.ge.s32.totalorder %s538_s17, 2  ;;  %s253_s4 = scalar_lea.sflag [#allocation5], %s252_s30 }
  0x71   : > { %p369_p8 = pnand %p771_p5, %p770_p4 }
  0x73   : > { %517 = dma.done.wait (!%p369_p8), %s253_s4, 128  }
  0x74   : > { %519 = vsyncadd (!%p369_p8), %s253_s4, 4294967168  ;;  %s262_s6 = scalar_lea.sflag [#allocation8], %s252_s30 }
  0x75   : > { %521 = dma.done.wait (!%p369_p8), %s262_s6, 128  }
  0x76   : > { %523 = vsyncadd (!%p369_p8), %s262_s6, 4294967168  ;;  %p21_p11 = scmp.ge.s32.totalorder %s592_s19, 4   ;;  %s772_s14 = smov %s530_s15 }
  0x77   : > { %s773_s15 = smov %s534_s16  ;;  %s774_s16 = smov %s604_s22 }
  0x78   : > { %s775_s17 = smov %s592_s19  ;;  %23 = sbr.rel (!%p21_p11) target bundleno = 9 (0x9), region = 90 }
  0x7f   :  { %267 = vsyncpa [#allocation4], 1 }
  0x80   :  { %269 = vsyncpa [#allocation4 + $0x1], 1 }
  0x81   :  { %270 = vsyncpa [#allocation5], 1 }
  0x82   :  { %272 = vsyncpa [#allocation5 + $0x1], 1 }
  0x83   :  { %273 = vsyncpa [#allocation8], 1 }
  0x84   :  { %275 = vsyncpa [#allocation8 + $0x1], 1 }

</bundles_post_ra>
